<compile_context>
chip_gen: v7x
topology: tpu7x:2x2x1
jax: 0.10.0
libtpu: 0.0.40
codegen_flags: <defaults>
</compile_context>

<pallas_src>
import functools

import jax
import jax.numpy as jnp
from jax.experimental import pallas as pl
from jax.experimental.pallas import tpu as pltpu

LANE = 128
SUBLANE = 8


def _round_up(n: int, m: int) -> int:
    return ((n + m - 1) // m) * m


def _make_critic_kernel(n_layers: int):
    """Fused kernel: a_sref, x_ref, (w_i, b_i)*n_layers, o_ref."""

    def kernel(*refs):
        a_ref = refs[0]          # SMEM scalar-prefetch: PReLU slope, shape (1,)
        x_ref = refs[1]          # (TB, in_dim) activation tile
        o_ref = refs[-1]         # (TB, out_pad) output tile

        a = a_ref[0]             # read the PReLU scalar exactly once
        h = x_ref[...]
        for i in range(n_layers):
            w_ref = refs[2 + 2 * i]
            b_ref = refs[3 + 2 * i]
            h = jnp.dot(h, w_ref[...], preferred_element_type=jnp.float32)
            h = h + b_ref[...]
            if i != n_layers - 1:
                # PReLU (Dropout is identity at inference)
                h = jnp.where(h >= 0.0, h, a * h)
        o_ref[...] = h.astype(o_ref.dtype)

    return kernel


def init_critic_params(key, layer_sizes):
    """Torch-like nn.Linear init; weights stored transposed as [in, out]."""
    params = []
    for i in range(len(layer_sizes) - 1):
        fan_in, fan_out = layer_sizes[i], layer_sizes[i + 1]
        key, kw, kb = jax.random.split(key, 3)
        bound = 1.0 / jnp.sqrt(fan_in)
        w = jax.random.uniform(kw, (fan_in, fan_out), jnp.float32, -bound, bound)
        b = jax.random.uniform(kb, (1, fan_out), jnp.float32, -bound, bound)
        params.append((w, b))
    prelu_a = jnp.full((1,), 0.25, dtype=jnp.float32)  # nn.PReLU() default init
    return params, prelu_a


def pad_params_lane_dense(params):
    """Zero-pad every output feature dim up to a multiple of 128 (lane-dense)."""
    padded = []
    prev_out_pad = None
    for i, (w, b) in enumerate(params):
        fan_in, fan_out = w.shape
        in_pad = fan_in if i == 0 else prev_out_pad
        out_pad = _round_up(fan_out, LANE)
        w_p = jnp.zeros((in_pad, out_pad), w.dtype).at[:fan_in, :fan_out].set(w)
        b_p = jnp.zeros((1, out_pad), b.dtype).at[:, :fan_out].set(b)
        padded.append((w_p, b_p))
        prev_out_pad = out_pad
    return padded


@functools.partial(jax.jit, static_argnames=("out_dim", "tb"))
def critic_forward(x, padded_params, prelu_a, *, out_dim: int, tb: int = 8):
    """Fused single-pallas_call Critic forward."""
    batch, in_dim = x.shape
    n_layers = len(padded_params)
    out_pad = padded_params[-1][0].shape[1]

    # Pad batch to a multiple of the batch tile (sublane-aligned).
    padded_batch = _round_up(batch, tb)
    if padded_batch != batch:
        x = jnp.pad(x, ((0, padded_batch - batch), (0, 0)))
    grid = (padded_batch // tb,)

    # index_maps receive (grid_i, prelu_a_sref) because of scalar prefetch.
    in_specs = [pl.BlockSpec((tb, in_dim), lambda i, a: (i, 0))]
    flat_params = []
    for w, b in padded_params:
        in_specs.append(pl.BlockSpec(w.shape, lambda i, a: (0, 0)))  # VMEM-resident
        in_specs.append(pl.BlockSpec(b.shape, lambda i, a: (0, 0)))
        flat_params += [w, b]
    out_specs = pl.BlockSpec((tb, out_pad), lambda i, a: (i, 0))

    # Advisory cost estimate for XLA scheduling.
    flops = 2 * padded_batch * sum(w.shape[0] * w.shape[1] for w, _ in padded_params)
    bytes_accessed = (
        x.size * 4
        + sum(w.size * 4 + b.size * 4 for w, b in padded_params)
        + padded_batch * out_pad * 4
    )

    out = pl.pallas_call(
        _make_critic_kernel(n_layers),
        out_shape=jax.ShapeDtypeStruct((padded_batch, out_pad), jnp.float32),
        grid_spec=pltpu.PrefetchScalarGridSpec(
            num_scalar_prefetch=1,
            grid=grid,
            in_specs=in_specs,
            out_specs=out_specs,
        ),
        compiler_params=pltpu.CompilerParams(
            dimension_semantics=("parallel",),  # megacore sharding on v7x
        ),
        cost_estimate=pl.CostEstimate(
            flops=flops, transcendentals=0, bytes_accessed=bytes_accessed
        ),
    )(prelu_a, x, *flat_params)

    return out[:batch, :out_dim]


def critic_forward_ref(x, params, prelu_a):
    """Pure-JAX reference for correctness checking (unpadded params)."""
    a = prelu_a[0]
    n_layers = len(params)
    for idx, (w, b) in enumerate(params):
        y = x @ w + b
        x = jnp.where(y >= 0.0, y, a * y) if idx != n_layers - 1 else y
    return x


if __name__ == "__main__":
    layer_sizes = [32, 64, 64, 1]   # Critic: scalar value head
    dropout = 0.1                   # inference mode -> identity
    batch = 16
    tb = 8                          # batch tile (multiple of 8 sublanes)

    key = jax.random.PRNGKey(0)
    key, kx = jax.random.split(key)
    x = jax.random.normal(kx, (batch, layer_sizes[0]), dtype=jnp.float32)

    params, prelu_a = init_critic_params(key, layer_sizes)
    padded_params = pad_params_lane_dense(params)

    out = critic_forward(x, tuple(padded_params), prelu_a,
                         out_dim=layer_sizes[-1], tb=tb)
    out = jax.block_until_ready(out)

    ref = critic_forward_ref(x, params, prelu_a)
    assert out.shape == (batch, layer_sizes[-1]), out.shape
    assert jnp.allclose(out, ref, atol=1e-5, rtol=1e-5), float(jnp.max(jnp.abs(out - ref)))

    print("KERNEL_OK")
</pallas_src>

<mosaic_0001>
module attributes {stable_mosaic.version = 11 : i64} {
  func.func @kernel(%arg0: i32, %arg1: memref<1xf32, #tpu.memory_space<smem>>, %arg2: memref<8x32xf32, #tpu.memory_space<vmem>>, %arg3: memref<32x128xf32, #tpu.memory_space<vmem>>, %arg4: memref<1x128xf32, #tpu.memory_space<vmem>>, %arg5: memref<128x128xf32, #tpu.memory_space<vmem>>, %arg6: memref<1x128xf32, #tpu.memory_space<vmem>>, %arg7: memref<128x128xf32, #tpu.memory_space<vmem>>, %arg8: memref<1x128xf32, #tpu.memory_space<vmem>>, %arg9: memref<8x128xf32, #tpu.memory_space<vmem>>) attributes {dimension_semantics = [#tpu.dimension_semantics<parallel>], iteration_bounds = array<i64: 2>, scalar_prefetch = 1 : i64, scratch_operands = 0 : i64, tpu.core_type = #tpu.core_type<tc>, window_params = [{transform_indices = @transform_0, window_bounds = array<i64: 8, 32>}, {pipeline_mode = #tpu.pipeline_mode<synchronous>, transform_indices = @transform_1, window_bounds = array<i64: 32, 128>}, {pipeline_mode = #tpu.pipeline_mode<synchronous>, transform_indices = @transform_2, window_bounds = array<i64: 1, 128>}, {pipeline_mode = #tpu.pipeline_mode<synchronous>, transform_indices = @transform_3, window_bounds = array<i64: 128, 128>}, {pipeline_mode = #tpu.pipeline_mode<synchronous>, transform_indices = @transform_4, window_bounds = array<i64: 1, 128>}, {pipeline_mode = #tpu.pipeline_mode<synchronous>, transform_indices = @transform_5, window_bounds = array<i64: 128, 128>}, {pipeline_mode = #tpu.pipeline_mode<synchronous>, transform_indices = @transform_6, window_bounds = array<i64: 1, 128>}, {transform_indices = @transform_7, window_bounds = array<i64: 8, 128>}]} {
    %c0 = arith.constant 0 : index
    %0 = memref.load %arg1[%c0] : memref<1xf32, #tpu.memory_space<smem>>
    %c0_0 = arith.constant 0 : index
    %c0_1 = arith.constant 0 : index
    %1 = vector.load %arg2[%c0_0, %c0_1] : memref<8x32xf32, #tpu.memory_space<vmem>>, vector<8x32xf32>
    %c0_2 = arith.constant 0 : index
    %c0_3 = arith.constant 0 : index
    %2 = vector.load %arg3[%c0_2, %c0_3] : memref<32x128xf32, #tpu.memory_space<vmem>>, vector<32x128xf32>
    %cst = arith.constant dense<0.000000e+00> : vector<8x128xf32>
    %3 = tpu.matmul %1, %2, %cst {dimension_numbers = #tpu.dot_dimension_numbers<[1], [0], [0], [1], [0, 0, 1, 1], [], []>} : vector<8x32xf32>, vector<32x128xf32>, vector<8x128xf32> -> vector<8x128xf32>
    %c0_4 = arith.constant 0 : index
    %c0_5 = arith.constant 0 : index
    %4 = vector.load %arg4[%c0_4, %c0_5] : memref<1x128xf32, #tpu.memory_space<vmem>>, vector<1x128xf32>
    %5 = vector.broadcast %4 : vector<1x128xf32> to vector<8x128xf32>
    %6 = arith.addf %3, %5 : vector<8x128xf32>
    %cst_6 = arith.constant 0.000000e+00 : f32
    %7 = vector.broadcast %cst_6 : f32 to vector<8x128xf32>
    %8 = arith.cmpf oge, %6, %7 : vector<8x128xf32>
    %9 = vector.broadcast %0 : f32 to vector<8x128xf32>
    %10 = arith.mulf %9, %6 : vector<8x128xf32>
    %11 = arith.select %8, %6, %10 : vector<8x128xi1>, vector<8x128xf32>
    %c0_7 = arith.constant 0 : index
    %c0_8 = arith.constant 0 : index
    %12 = vector.load %arg5[%c0_7, %c0_8] : memref<128x128xf32, #tpu.memory_space<vmem>>, vector<128x128xf32>
    %cst_9 = arith.constant dense<0.000000e+00> : vector<8x128xf32>
    %13 = tpu.matmul %11, %12, %cst_9 {dimension_numbers = #tpu.dot_dimension_numbers<[1], [0], [0], [1], [0, 0, 1, 1], [], []>} : vector<8x128xf32>, vector<128x128xf32>, vector<8x128xf32> -> vector<8x128xf32>
    %c0_10 = arith.constant 0 : index
    %c0_11 = arith.constant 0 : index
    %14 = vector.load %arg6[%c0_10, %c0_11] : memref<1x128xf32, #tpu.memory_space<vmem>>, vector<1x128xf32>
    %15 = vector.broadcast %14 : vector<1x128xf32> to vector<8x128xf32>
    %16 = arith.addf %13, %15 : vector<8x128xf32>
    %cst_12 = arith.constant 0.000000e+00 : f32
    %17 = vector.broadcast %cst_12 : f32 to vector<8x128xf32>
    %18 = arith.cmpf oge, %16, %17 : vector<8x128xf32>
    %19 = vector.broadcast %0 : f32 to vector<8x128xf32>
    %20 = arith.mulf %19, %16 : vector<8x128xf32>
    %21 = arith.select %18, %16, %20 : vector<8x128xi1>, vector<8x128xf32>
    %c0_13 = arith.constant 0 : index
    %c0_14 = arith.constant 0 : index
    %22 = vector.load %arg7[%c0_13, %c0_14] : memref<128x128xf32, #tpu.memory_space<vmem>>, vector<128x128xf32>
    %cst_15 = arith.constant dense<0.000000e+00> : vector<8x128xf32>
    %23 = tpu.matmul %21, %22, %cst_15 {dimension_numbers = #tpu.dot_dimension_numbers<[1], [0], [0], [1], [0, 0, 1, 1], [], []>} : vector<8x128xf32>, vector<128x128xf32>, vector<8x128xf32> -> vector<8x128xf32>
    %c0_16 = arith.constant 0 : index
    %c0_17 = arith.constant 0 : index
    %24 = vector.load %arg8[%c0_16, %c0_17] : memref<1x128xf32, #tpu.memory_space<vmem>>, vector<1x128xf32>
    %25 = vector.broadcast %24 : vector<1x128xf32> to vector<8x128xf32>
    %26 = arith.addf %23, %25 : vector<8x128xf32>
    %c0_18 = arith.constant 0 : index
    %c0_19 = arith.constant 0 : index
    %27 = vector.load %arg9[%c0_18, %c0_19] : memref<8x128xf32, #tpu.memory_space<vmem>>, vector<8x128xf32>
    tpu.vector_store %arg9[%c0_18, %c0_19], %26 {strides = array<i32>} : memref<8x128xf32, #tpu.memory_space<vmem>>, vector<8x128xf32>,
    return
  }
  func.func @transform_0(%arg0: i32, %arg1: memref<1xf32, #tpu.memory_space<smem>>) -> (i32, i32) {
    %c0_i32 = arith.constant 0 : i32
    %c0_i32_0 = arith.constant 0 : i32
    return %arg0, %c0_i32 : i32, i32
  }
  func.func @transform_1(%arg0: i32, %arg1: memref<1xf32, #tpu.memory_space<smem>>) -> (i32, i32) {
    %c0_i32 = arith.constant 0 : i32
    %c0_i32_0 = arith.constant 0 : i32
    %c0_i32_1 = arith.constant 0 : i32
    return %c0_i32, %c0_i32_0 : i32, i32
  }
  func.func @transform_2(%arg0: i32, %arg1: memref<1xf32, #tpu.memory_space<smem>>) -> (i32, i32) {
    %c0_i32 = arith.constant 0 : i32
    %c0_i32_0 = arith.constant 0 : i32
    %c0_i32_1 = arith.constant 0 : i32
    return %c0_i32, %c0_i32_0 : i32, i32
  }
  func.func @transform_3(%arg0: i32, %arg1: memref<1xf32, #tpu.memory_space<smem>>) -> (i32, i32) {
    %c0_i32 = arith.constant 0 : i32
    %c0_i32_0 = arith.constant 0 : i32
    %c0_i32_1 = arith.constant 0 : i32
    return %c0_i32, %c0_i32_0 : i32, i32
  }
  func.func @transform_4(%arg0: i32, %arg1: memref<1xf32, #tpu.memory_space<smem>>) -> (i32, i32) {
    %c0_i32 = arith.constant 0 : i32
    %c0_i32_0 = arith.constant 0 : i32
    %c0_i32_1 = arith.constant 0 : i32
    return %c0_i32, %c0_i32_0 : i32, i32
  }
  func.func @transform_5(%arg0: i32, %arg1: memref<1xf32, #tpu.memory_space<smem>>) -> (i32, i32) {
    %c0_i32 = arith.constant 0 : i32
    %c0_i32_0 = arith.constant 0 : i32
    %c0_i32_1 = arith.constant 0 : i32
    return %c0_i32, %c0_i32_0 : i32, i32
  }
  func.func @transform_6(%arg0: i32, %arg1: memref<1xf32, #tpu.memory_space<smem>>) -> (i32, i32) {
    %c0_i32 = arith.constant 0 : i32
    %c0_i32_0 = arith.constant 0 : i32
    %c0_i32_1 = arith.constant 0 : i32
    return %c0_i32, %c0_i32_0 : i32, i32
  }
  func.func @transform_7(%arg0: i32, %arg1: memref<1xf32, #tpu.memory_space<smem>>) -> (i32, i32) {
    %c0_i32 = arith.constant 0 : i32
    %c0_i32_0 = arith.constant 0 : i32
    return %arg0, %c0_i32 : i32, i32
  }
}

</mosaic_0001>

<bundles_post_ra>
// kernel: critic_forward.1
= control target key start
LH: loop header
LB: loop body
LE: loop exit
PB: predicated region body
PF: predicated region fallthrough
CT: control target
= control target key end

     0   :  { %s1447_s0 = inlined_call_operand.<no memory space> [shape: f32[1], index: 0, kind: input, shape index: {}]   ;;  %s1448_s1 = inlined_call_operand.hbm [shape: f32[16,32], index: 1, kind: input, shape index: {}]   ;;  %s1449_s2 = inlined_call_operand.hbm [shape: f32[32,128], index: 2, kind: input, shape index: {}]   ;;  %s1450_s3 = inlined_call_operand.vmem [shape: f32[1,128], index: 3, kind: input, shape index: {}]   ;;  %s1451_s4 = inlined_call_operand.hbm [shape: f32[128,128], index: 4, kind: input, shape index: {}]   ;;  %s1452_s5 = inlined_call_operand.vmem [shape: f32[1,128], index: 5, kind: input, shape index: {}]   ;;  %s1453_s6 = inlined_call_operand.hbm [shape: f32[128,128], index: 6, kind: input, shape index: {}]   ;;  %s1454_s7 = inlined_call_operand.vmem [shape: f32[1,128], index: 7, kind: input, shape index: {}]   ;;  %s1455_s8 = inlined_call_operand.vmem [shape: f32[16,128], index: 8, kind: output, shape index: {}]  }
   0x1   :  { %13 = sst [smem:[#allocation3]] %s1447_s0 }
   0x2   :  { %14 = vsyncpa [#allocation5], 0 }
   0x3   :  { %16 = vsyncpa [#allocation5 + $0x1], 0 }
   0x4   :  { %17 = vsyncpa [#allocation7], 0 }
   0x5   :  { %18 = vsyncpa [#allocation10], 0  ;;  %s1199_s29 = smov 0   ;;  %s1201_s30 = smov 0  }
   0x6   :  { %s1203_s9 = smov 0   ;;  %s1205_s10 = smov 0  }
   0x7 LB: > { %s1218_s0 = sadd.s32 4294967295, %s1140_s10   ;;  %p44_p0 = scmp.ne.s32.totalorder %s1132_s30, %s1128_s29  ;;  %s1140_s10 = sphi %s1205_s10, %s1473_s10   ;;  %s1136_s9 = sphi %s1203_s9, %s1472_s9   ;;  %s1132_s30 = sphi %s1201_s30, %s1471_s30   ;;  %s1128_s29 = sphi %s1199_s29, %s1470_s29  }
   0x8   : > { %p1456_p1 = scmp.eq.s32.totalorder %s1218_s0, 0  ;;  %p716_p2 = scmp.ge.s32.totalorder %s1140_s10, 1 }
   0x9   : > { %p207_p3 = scmp.lt.s32.totalorder %s1140_s10, 3  ;;  %s1142_s13 = smov [#allocation6]  }
   0xa   : > { %p1226_p4 = por %p1456_p1, %p44_p0  ;;  %s219_s14 = sshll.u32 %s1142_s13, 4  ;;  %s1234_s14 = int_to_ptr.vmem [resolvable:$true] %s219_s14 }
   0xb   : > { %p1230_p5 = pnand %p716_p2, %p207_p3  ;;  %s1143_s16 = smov [#allocation8]  }
   0xc   : > { %s1459_s11 = scalar_select %p1226_p4, 1, 0 }
   0xd   : > { %s1460_s12 = scalar_select %p1230_p5, 1, 0 }
   0xe   : > { %p923_p6 = pneg %p1230_p5  ;;  %s235_s17 = sshll.u32 %s1143_s16, 4  ;;  %s1244_s17 = int_to_ptr.vmem [resolvable:$true] %s235_s17 }
   0xf   : > { %s1144_s18 = smov [#allocation9]   ;;  %s984_s22 = scalar_lea.hbm %s1449_s2, 512 }
  0x10   : > { %p1240_p7 = pnand %p923_p6, %p1456_p1  ;;  %s1246_s19 = sshll.u32 %s1144_s18, 4  ;;  %s252_s19 = int_to_ptr.vmem [resolvable:$true] %s1246_s19 }
  0x11   : > { %p985_p8 = scmp.ne.s32.totalorder %s1449_s2, %s984_s22  ;;  %p991_p12 = scmp.lt.u32.totalorder %s984_s22, %s1449_s2 }
  0x12   : > { %p1256_p9 = pneg %p1240_p7 }
  0x14   : > { %p987_p10 = pnand %p1256_p9, %p985_p8 }
  0x16   : > { %p988_p11 = pneg %p987_p10 }
  0x18   : > { %p993_p13 = pnand %p991_p12, %p988_p11 }
  0x1a   : > { %996 = shalt.err (!%p993_p13)
}
  0x1b   : > { %s997_s28 = scalar_lea.vmem %s1234_s14, 512  ;;  %p1005_p6 = scmp.lt.s32.totalorder %s1234_s14, %s1234_s14 }
  0x1c   : > { %p998_p0 = scmp.ne.s32.totalorder %s1234_s14, %s997_s28  ;;  %p1006_p1 = scmp.lt.s32.totalorder %s997_s28, %s997_s28 }
  0x1e   : > { %p1000_p2 = pnand %p998_p0, %p1256_p9  ;;  %p1007_p8 = por %p1006_p1, %p1005_p6 }
  0x20   : > { %p1001_p3 = pneg %p1000_p2 }
  0x22   : > { %p1008_p10 = pnand %p1007_p8, %p1001_p3 }
  0x24   : > { %1011 = shalt.err (!%p1008_p10)
}
  0x25   : > { %s1145_s29 = smov 128   ;;  %s1146_s13 = smov 8  }
  0x26   : > { %926 = dma.hbm_to_vmem [thread:$0]  (!%p1240_p7), %s1449_s2, 512, %s1234_s14, [#allocation7], %s1145_s29, %s1145_s29, %s1146_s13  }
  0x27   : > { %s1012_s22 = scalar_lea.hbm %s1451_s4, 2048 }
  0x28   : > { %p1013_p1 = scmp.ne.s32.totalorder %s1451_s4, %s1012_s22  ;;  %p1019_p13 = scmp.lt.u32.totalorder %s1012_s22, %s1451_s4 }
  0x2a   : > { %p1015_p11 = pnand %p1013_p1, %p1256_p9 }
  0x2c   : > { %p1016_p12 = pneg %p1015_p11 }
  0x2e   : > { %p1021_p0 = pnand %p1019_p13, %p1016_p12 }
  0x30   : > { %1024 = shalt.err (!%p1021_p0)
}
  0x31   : > { %s1025_s14 = scalar_lea.vmem %s1244_s17, 2048  ;;  %p1033_p8 = scmp.lt.s32.totalorder %s1244_s17, %s1244_s17 }
  0x32   : > { %p1026_p2 = scmp.ne.s32.totalorder %s1244_s17, %s1025_s14  ;;  %p1034_p10 = scmp.lt.s32.totalorder %s1025_s14, %s1025_s14 }
  0x34   : > { %p1028_p3 = pnand %p1026_p2, %p1256_p9  ;;  %p1035_p1 = por %p1034_p10, %p1033_p8 }
  0x36   : > { %p1029_p6 = pneg %p1028_p3 }
  0x38   : > { %p1036_p11 = pnand %p1035_p1, %p1029_p6 }
  0x3a   : > { %1039 = shalt.err (!%p1036_p11)
}
  0x3b   : > { %929 = dma.hbm_to_vmem [thread:$0]  (!%p1240_p7), %s1451_s4, 2048, %s1244_s17, [#allocation7], %s1145_s29, %s1145_s29, %s1146_s13  }
  0x3c   : > { %s1040_s21 = scalar_lea.hbm %s1453_s6, 2048 }
  0x3d   : > { %p1041_p12 = scmp.ne.s32.totalorder %s1453_s6, %s1040_s21  ;;  %p1047_p2 = scmp.lt.u32.totalorder %s1040_s21, %s1453_s6 }
  0x3f   : > { %p1043_p13 = pnand %p1041_p12, %p1256_p9 }
  0x41   : > { %p1044_p0 = pneg %p1043_p13 }
  0x43   : > { %p1049_p3 = pnand %p1047_p2, %p1044_p0 }
  0x45   : > { %1052 = shalt.err (!%p1049_p3)
}
  0x46   : > { %s1053_s27 = scalar_lea.vmem %s252_s19, 2048  ;;  %p1061_p1 = scmp.lt.s32.totalorder %s252_s19, %s252_s19 }
  0x47   : > { %p1054_p6 = scmp.ne.s32.totalorder %s252_s19, %s1053_s27  ;;  %p1062_p11 = scmp.lt.s32.totalorder %s1053_s27, %s1053_s27 }
  0x49   : > { %p1056_p8 = pnand %p1054_p6, %p1256_p9  ;;  %p1063_p4 = por %p1062_p11, %p1061_p1 }
  0x4b   : > { %p1057_p10 = pneg %p1056_p8 }
  0x4d   : > { %p1064_p5 = pnand %p1063_p4, %p1057_p10 }
  0x4f   : > { %1067 = shalt.err (!%p1064_p5)
}
  0x50   : > { %932 = dma.hbm_to_vmem [thread:$0]  (!%p1240_p7), %s1453_s6, 2048, %s252_s19, [#allocation10], %s1145_s29, %s1145_s29, %s1146_s13  }
  0x51   : > { %s1329_s25 = sadd.s32 1, %s1140_s10   ;;  %s31_s28 = sadd.s32 1, %s1136_s9 }
  0x52   : > { %s28_s15 = ssub.s32 %s1140_s10, %s1329_s25  ;;  %p38_p5 = scmp.ne.s32.totalorder %s1136_s9, %s1132_s30 }
  0x53   : > { %p29_p4 = scmp.eq.s32.totalorder %s28_s15, 0  ;;  %p39_p9 = scmp.eq.s32.totalorder %s1140_s10, 0 }
  0x54   : > { %p940_p12 = scmp.lt.s32.totalorder %s1140_s10, 2  ;;  %s268_s18 = sand.u32 1, %s1136_s9  }
  0x55   : > { %s1339_s16 = scalar_select %p29_p4, %s1136_s9, %s31_s28  }
  0x56   : > { %p40_p13 = por %p39_p9, %p38_p5  ;;  %s721_s20 = sshll.u32 %s268_s18, 3 }
  0x57   : > { %s722_s21 = sshll.u32 %s1140_s10, 7  ;;  %s272_s19 = scalar_lea.vmem [#allocation4], %s721_s20 }
  0x58   : > { %s1346_s24 = scalar_lea.hbm %s1448_s1, %s722_s21  ;;  %s279_s29 = sshll.u32 %s272_s19, 4  ;;  %s1348_s29 = int_to_ptr.vmem [resolvable:$true] %s279_s29 }
  0x59   : > { %p1350_p7 = pnand %p940_p12, %p40_p13  ;;  %s269_s10 = scalar_lea.sflag [#allocation5], %s268_s18 }
  0x5a   : > { %s1068_s26 = scalar_lea.hbm %s1346_s24, 128  ;;  %s1073_s14 = scalar_lea.hbm %s1448_s1, 256 }
  0x5b   : > { %p1069_p0 = scmp.ne.s32.totalorder %s1346_s24, %s1068_s26  ;;  %p1070_p2 = pneg %p1350_p7 }
  0x5c   : > { %p1074_p8 = scmp.lt.u32.totalorder %s1346_s24, %s1448_s1  ;;  %p1075_p10 = scmp.lt.u32.totalorder %s1073_s14, %s1068_s26 }
  0x5d   : > { %p1071_p3 = pnand %p1070_p2, %p1069_p0  ;;  %p1077_p11 = scmp.lt.u32.totalorder %s1068_s26, %s1346_s24 }
  0x5e   : > { %p1076_p1 = por %p1075_p10, %p1074_p8 }
  0x5f   : > { %p1072_p6 = pneg %p1071_p3 }
  0x60   : > { %p1078_p4 = por %p1077_p11, %p1076_p1 }
  0x62   : > { %p1079_p5 = pnand %p1078_p4, %p1072_p6 }
  0x64   : > { %1082 = shalt.err (!%p1079_p5)
}
  0x65   : > { %s1083_s18 = scalar_lea.vmem %s1348_s29, 128  ;;  %s1147_s20 = smov [#allocation4]  }
  0x66   : > { %p1084_p9 = scmp.ne.s32.totalorder %s1348_s29, %s1083_s18  ;;  %s1088_s21 = sshll.u32 %s1147_s20, 4  ;;  %s1089_s21 = int_to_ptr.vmem [resolvable:$false] %s1088_s21 }
  0x67   : > { %s1090_s22 = scalar_lea.vmem %s1089_s21, 256  ;;  %p1091_p0 = scmp.lt.s32.totalorder %s1348_s29, %s1089_s21 }
  0x68   : > { %p1086_p12 = pnand %p1084_p9, %p1070_p2  ;;  %p1092_p3 = scmp.lt.s32.totalorder %s1090_s22, %s1083_s18 }
  0x6a   : > { %p1087_p13 = pneg %p1086_p12  ;;  %p1093_p8 = por %p1092_p3, %p1091_p0 }
  0x6c   : > { %p1094_p10 = pnand %p1093_p8, %p1087_p13 }
  0x6e   : > { %1097 = shalt.err (!%p1094_p10)
}
  0x6f   : > { %936 = dma.hbm_to_vmem [thread:$0]  (!%p1350_p7), %s1346_s24, 128, %s1348_s29, %s269_s10  }
  0x70   : > { %p1464_p6 = scmp.ne.s32.totalorder %s1460_s12, 0 }
  0x71   : > { %s290_s23 = sand.u32 (!%p1464_p6), 1, %s1132_s30   ;;  %p1465_p2 = scmp.ne.s32.totalorder (!%p1464_p6), %s1459_s11, 0 }
  0x72   : > { %288 = sbr.rel (%p1464_p6) target bundleno = 787 (0x313), region = 48  ;;  %s1382_s19 = sshll.u32 (!%p1464_p6), %s290_s23, 3 }
  0x73   : > { %s291_s26 = scalar_lea.sflag (!%p1464_p6), [#allocation5], %s290_s23  ;;  %s294_s27 = scalar_lea.vmem (!%p1464_p6), [#allocation4], %s1382_s19 }
  0x79   : > { %1115 = dma.done.wait (%p1465_p2), %s291_s26, 128  }
  0x7a   : > { %1117 = vsyncadd (%p1465_p2), %s291_s26, 4294967168  ;;  %p1466_p1 = scmp.eq.s32.totalorder %s1218_s0, 0 }
  0x7c   : > { %1119 = dma.done.wait (%p1466_p1), [#allocation7], 2560   ;;  %p1467_p7 = pmov %p1466_p1 }
  0x7d   : > { %p1468_p11 = pmov %p1466_p1 }
  0x7e   : > { %1121 = vsyncadd (%p1467_p7), [#allocation7], 4294964736 }
  0x7f   : > { %1123 = dma.done.wait (%p1468_p11), [#allocation10], 2048   ;;  %p1469_p4 = pmov %p1466_p1 }
  0x80   : > { %v1148_v0 = vmov 0.0|0.0   ;;  %vm1149_vm0 = vmmov 0   ;;  %v1150_v1 = vmov 0.0   ;;  %v342_v2 = vld [vmem:[#allocation6] sm:$0xff]  ;;  %v343_v3 = vld [vmem:[#allocation6 + $0x8] sm:$0xff]  ;;  %v344_v4 = vld [vmem:[#allocation6 + $0x10] sm:$0xff] }
  0x81   : > { %1125 = vsyncadd (%p1469_p4), [#allocation10], 4294965248  ;;  %855 = vmatprep.subr.bf16.mxu0 %v1148_v0  ;;  %782 = vmatprep.mubr.msk.f32.mxu0 %vm1149_vm0, %v1150_v1  ;;  %v856_v5 = vpack.c.bf16 %v343_v3, %v342_v2  ;;  %v345_v6 = vld [vmem:[#allocation6 + $0x18] sm:$0xff]  ;;  %v431_v7 = vld [vmem:[#allocation8] sm:$0xff]  ;;  %vm353_vm1 = vcmask 261120   ;;  %s340_s11 = sld [smem:[#allocation3]] }
  0x82   : > { %861 = vmatprep.subr.bf16.mxu1 %v1148_v0  ;;  %817 = vmatprep.mubr.msk.f32.mxu1 %vm1149_vm0, %v1150_v1  ;;  %v432_v8 = vld [vmem:[#allocation8 + $0x8] sm:$0xff]  ;;  %v433_v9 = vld [vmem:[#allocation8 + $0x10] sm:$0xff]  ;;  %v434_v10 = vld [vmem:[#allocation8 + $0x18] sm:$0xff]  ;;  %v859_v11 = vpack.c.bf16 %v345_v6, %v344_v4  ;;  %p336_p5 = scmp.lt.s32.totalorder %s1218_s0, 1 }
  0x83   : > { %857 = vmatpush3.bf16.msra.mxu0 %v856_v5  ;;  %v862_v12 = vpack.c.bf16 %v432_v8, %v431_v7  ;;  %v865_v13 = vpack.c.bf16 %v434_v10, %v433_v9  ;;  %v435_v14 = vld [vmem:[#allocation8 + $0x20] sm:$0xff]  ;;  %v436_v15 = vld [vmem:[#allocation8 + $0x28] sm:$0xff]  ;;  %v341_v16 = vld [vmem:[%s294_s27] sm:$0xff] }
  0x84   : > { %858 = vmatprep.subr.bf16.mxu0 %v1148_v0  ;;  %v868_v17 = vpack.c.bf16 %v436_v15, %v435_v14  ;;  %v437_v18 = vld [vmem:[#allocation8 + $0x30] sm:$0xff]  ;;  %v438_v19 = vld [vmem:[#allocation8 + $0x38] sm:$0xff]  ;;  %v439_v21 = vld [vmem:[#allocation8 + $0x40] sm:$0xff]  ;;  %s1475_s0 = smov (!%p336_p5, %s1218_s0), 1 }
  0x85   : > { %863 = vmatpush3.bf16.msra.mxu1 %v862_v12  ;;  %v871_v20 = vpack.c.bf16 %v438_v19, %v437_v18  ;;  %v440_v22 = vld [vmem:[#allocation8 + $0x48] sm:$0xff]  ;;  %v441_v24 = vld [vmem:[#allocation8 + $0x50] sm:$0xff]  ;;  %v442_v25 = vld [vmem:[#allocation8 + $0x58] sm:$0xff]  ;;  %s728_s10 = sshll.u32 %s1475_s0, 3 }
  0x86   : > { %864 = vmatprep.subr.bf16.mxu1 %v1148_v0  ;;  %v874_v23 = vpack.c.bf16 %v440_v22, %v439_v21  ;;  %v877_v26 = vpack.c.bf16 %v442_v25, %v441_v24  ;;  %v443_v27 = vld [vmem:[#allocation8 + $0x60] sm:$0xff]  ;;  %v444_v28 = vld [vmem:[#allocation8 + $0x68] sm:$0xff]  ;;  %v445_v30 = vld [vmem:[#allocation8 + $0x70] sm:$0xff]  ;;  %s339_s18 = scalar_lea.vmem %s1455_s8, %s728_s10 }
  0x87   : > { %860 = vmatpush3.bf16.msra.mxu0 %v859_v11  ;;  %v880_v29 = vpack.c.bf16 %v444_v28, %v443_v27  ;;  %v446_v31 = vld [vmem:[#allocation8 + $0x78] sm:$0xff]  ;;  %v527_v33 = vld [vmem:[#allocation9] sm:$0xff]  ;;  %v528_v34 = vld [vmem:[#allocation9 + $0x8] sm:$0xff]  ;;  %v428_v56 = vstv %s340_s11 }
  0x88   : > { %885 = vmatprep.subr.bf16.mxu0 %v1148_v0  ;;  %v883_v32 = vpack.c.bf16 %v446_v31, %v445_v30  ;;  %v529_v35 = vld [vmem:[#allocation9 + $0x10] sm:$0xff]  ;;  %v886_v36 = vpack.c.bf16 %v528_v34, %v527_v33  ;;  %v530_v37 = vld [vmem:[#allocation9 + $0x18] sm:$0xff]  ;;  %v531_v39 = vld [vmem:[#allocation9 + $0x20] sm:$0xff] }
  0x89   : > { %866 = vmatpush3.bf16.msra.mxu1 %v865_v13  ;;  %v889_v38 = vpack.c.bf16 %v530_v37, %v529_v35  ;;  %v532_v40 = vld [vmem:[#allocation9 + $0x28] sm:$0xff]  ;;  %v533_v42 = vld [vmem:[#allocation9 + $0x30] sm:$0xff]  ;;  %v534_v43 = vld [vmem:[#allocation9 + $0x38] sm:$0xff] }
  0x8a   : > { %783 = vmatmul.mubr.msk.f32.vlgmr.msra.gmra.mrb[0].mxu0 %vm353_vm1, %v341_v16  ;;  %867 = vmatprep.subr.bf16.mxu1 %v1148_v0  ;;  %v892_v41 = vpack.c.bf16 %v532_v40, %v531_v39  ;;  %v895_v44 = vpack.c.bf16 %v534_v43, %v533_v42  ;;  %v535_v45 = vld [vmem:[#allocation9 + $0x40] sm:$0xff]  ;;  %v536_v46 = vld [vmem:[#allocation9 + $0x48] sm:$0xff]  ;;  %v537_v48 = vld [vmem:[#allocation9 + $0x50] sm:$0xff] }
  0x8b   : > { %852 = vmatprep.mubr.msk.f32.mxu0 %vm1149_vm0, %v1150_v1  ;;  %887 = vmatpush3.bf16.msra.mxu0 %v886_v36  ;;  %v898_v47 = vpack.c.bf16 %v536_v46, %v535_v45  ;;  %v538_v49 = vld [vmem:[#allocation9 + $0x58] sm:$0xff]  ;;  %v539_v51 = vld [vmem:[#allocation9 + $0x60] sm:$0xff]  ;;  %v540_v52 = vld [vmem:[#allocation9 + $0x68] sm:$0xff] }
  0x8c   : > { %888 = vmatprep.subr.bf16.mxu0 %v1148_v0  ;;  %v901_v50 = vpack.c.bf16 %v538_v49, %v537_v48  ;;  %v904_v53 = vpack.c.bf16 %v540_v52, %v539_v51  ;;  %v729_v54 = vld [vmem:[%s1450_s3] ss:$0 sm:$0xff]  ;;  %v542_v62 = vld [vmem:[#allocation9 + $0x78] sm:$0xff] }
  0x8d   : > { %869 = vmatpush3.bf16.msra.mxu1 %v868_v17  ;;  %v541_v61 = vld [vmem:[#allocation9 + $0x70] sm:$0xff] }
  0x8e   : > { %870 = vmatprep.subr.bf16.mxu1 %v1148_v0  ;;  %v907_v63 = vpack.c.bf16 %v542_v62, %v541_v61  ;;  %v732_v6 = vld [vmem:[%s1454_s7] ss:$0 sm:$0xff] }
  0x8f   : > { %890 = vmatpush3.bf16.msra.mxu0 %v889_v38 }
  0x90   : > { %891 = vmatprep.subr.bf16.mxu0 %v1148_v0 }
  0x91   : > { %872 = vmatpush3.bf16.msra.mxu1 %v871_v20 }
  0x92   : > { %873 = vmatprep.subr.bf16.mxu1 %v1148_v0 }
  0x93   : > { %893 = vmatpush3.bf16.msra.mxu0 %v892_v41 }
  0x94   : > { %894 = vmatprep.subr.bf16.mxu0 %v1148_v0 }
  0x95   : > { %875 = vmatpush3.bf16.msra.mxu1 %v874_v23 }
  0x96   : > { %876 = vmatprep.subr.bf16.mxu1 %v1148_v0 }
  0x97   : > { %896 = vmatpush3.bf16.msra.mxu0 %v895_v44 }
  0x98   : > { %897 = vmatprep.subr.bf16.mxu0 %v1148_v0 }
  0x99   : > { %878 = vmatpush3.bf16.msra.mxu1 %v877_v26 }
  0x9a   : > { %879 = vmatprep.subr.bf16.mxu1 %v1148_v0 }
  0x9b   : > { %899 = vmatpush3.bf16.msra.mxu0 %v898_v47 }
  0x9c   : > { %900 = vmatprep.subr.bf16.mxu0 %v1148_v0 }
  0x9d   : > { %881 = vmatpush3.bf16.msra.mxu1 %v880_v29 }
  0x9e   : > { %882 = vmatprep.subr.bf16.mxu1 %v1148_v0 }
  0x9f   : > { %902 = vmatpush3.bf16.msra.mxu0 %v901_v50 }
  0xa0   : > { %903 = vmatprep.subr.bf16.mxu0 %v1148_v0 }
  0xa1   : > { %884 = vmatpush3.bf16.msra.mxu1 %v883_v32 }
  0xa3   : > { %905 = vmatpush3.bf16.msra.mxu0 %v904_v53 }
  0xa4   : > { %906 = vmatprep.subr.bf16.mxu0 %v1148_v0  ;;  %v731_v0 = vld [vmem:[%s1452_s5] ss:$0 sm:$0xff] }
  0xa7   : > { %908 = vmatpush3.bf16.msra.mxu0 %v907_v63 }
 0x15d   : > { %v423_v55 = vpop.f32.mrb[0].mxu0 }
 0x15e   : > { %v424_v57 = vadd.f32 %v729_v54, %v423_v55  ;;  %v784_v58 = vpop.f32.mrb[1].mxu0 }
 0x160   : > { %v429_v59 = vmul.f32 %v428_v56, %v424_v57  ;;  %vm427_vm2 = vcmp.ge.f32.partialorder %v424_v57, 0.0 }
 0x162   : > { %v430_v60 = vsel %vm427_vm2, %v424_v57, %v429_v59 }
 0x163   : > { %818 = vmatmul.mubr.f32.vlgmr.msra.gmra.mrb[0].mxu1 %v430_v60 }
 0x236   : > { %v520_v1 = vpop.f32.mrb[0].mxu1 }
 0x237   : > { %v521_v2 = vadd.f32 %v731_v0, %v520_v1  ;;  %v819_v3 = vpop.f32.mrb[1].mxu1 }
 0x239   : > { %vm524_vm3 = vcmp.ge.f32.partialorder %v521_v2, 0.0  ;;  %v525_v4 = vmul.f32 %v521_v2, %v428_v56 }
 0x23b   : > { %v526_v5 = vsel %vm524_vm3, %v521_v2, %v525_v4 }
 0x23c   : > { %853 = vmatmul.mubr.f32.vlgmr.msra.gmra.mrb[2].mxu0 %v526_v5 }
 0x30f   : > { %v616_v7 = vpop.f32.mrb[2].mxu0 }
 0x310   : > { %v617_v8 = vadd.f32 %v732_v6, %v616_v7  ;;  %v854_v9 = vpop.f32.mrb[3].mxu0 }
 0x312   : > { %620 = vst [vmem:[%s339_s18] sm:$0xff] %v617_v8 }
 0x313 PF: > { %p21_p9 = scmp.ge.s32.totalorder %s1329_s25, 4   ;;  %s1470_s29 = smov %s1132_s30 }
 0x314   : > { %s1471_s30 = smov %s1136_s9  ;;  %s1472_s9 = smov %s1339_s16 }
 0x315   : > { %s1473_s10 = smov %s1329_s25  ;;  %23 = sbr.rel (!%p21_p9) target bundleno = 7 (0x7), region = 100 }
 0x31c   :  { %640 = vsyncpa [#allocation5], 1 }
 0x31d   :  { %642 = vsyncpa [#allocation5 + $0x1], 1 }
 0x31e   :  { %643 = vsyncpa [#allocation7], 1 }
 0x31f   :  { %644 = vsyncpa [#allocation10], 1 }

</bundles_post_ra>
